<compile_context>
chip_gen: v6e
topology: v6e:2x2x1
jax: 0.10.0
libtpu: 0.0.40
codegen_flags: <defaults>
</compile_context>

<pallas_src>
import jax
import jax.numpy as jnp
from jax.experimental import pallas as pl
from jax.experimental.pallas import tpu as pltpu

# ---------------- problem sizes (small, consistent with the module) ----------
B, C, H, W = 2, 4, 16, 16        # input images, NCHW (like PyTorch)
KH = KW = 3                      # conv kernel
HIDDEN = 32                      # encoder latent dim
S_COUNT, Y_COUNT = 2, 5
NUM_CLUSTERS = S_COUNT * Y_COUNT # joint (s, y) clustering head
P = H * W                        # spatial positions after 'same' conv
K = C * KH * KW                  # patch feature size (36)

# lane-padded sizes (everything a clean multiple of 128 on the lane axis)
K_PAD = 128
H_PAD = 128
NC_PAD = 128


# ---------------- Pallas kernel: encoder + classifier, fully fused ----------
def joint_model_kernel(patches_ref, w_conv_ref, b_conv_ref, pool_ref,
                       w_cls_ref, b_cls_ref, logits_ref):
    # patches_ref : (B*P, K_PAD)    im2col patches, all batch elements stacked
    # w_conv_ref  : (K_PAD, H_PAD)  conv weight (zero-padded)
    # b_conv_ref  : (1, H_PAD)      conv bias   (zero-padded)
    # pool_ref    : (B, B*P)        segment-mean matrix (1/P folded in)
    # w_cls_ref   : (H_PAD, NC_PAD) classifier weight (zero-padded)
    # b_cls_ref   : (1, NC_PAD)     classifier bias   (zero-padded)
    # logits_ref  : (B, NC_PAD)     lane-dense logits slab

    # Conv2d as one big matmul over im2col patches, + bias, + ReLU  (encoder body)
    feat = jnp.dot(patches_ref[...], w_conv_ref[...],
                   preferred_element_type=jnp.float32)          # (B*P, H_PAD)
    feat = jnp.maximum(feat + b_conv_ref[...], 0.0)

    # Global average pool per batch element as an MXU matmul (1/P already folded)
    z = jnp.dot(pool_ref[...], feat,
                preferred_element_type=jnp.float32)             # (B, H_PAD)

    # Linear classifier head -> raw cluster logits (lane-dense store)
    logits = jnp.dot(z, w_cls_ref[...],
                     preferred_element_type=jnp.float32) + b_cls_ref[...]
    logits_ref[...] = logits.astype(logits_ref.dtype)


def _joint_model_forward_impl(x, w_conv, b_conv, w_cls, b_cls):
    """x: (B, C, H, W) float32 (NCHW, like PyTorch).  Returns (logits, None)."""
    Bx = x.shape[0]
    BP = Bx * P

    # ---- glue: im2col with 'same' padding, built directly in (B, P, K) order ----
    # feature order (c, kh, kw) matches PyTorch Conv2d weight (out, in, kh, kw).reshape(out, -1)
    x_nhwc = jnp.transpose(x, (0, 2, 3, 1)).astype(jnp.float32)       # (B, H, W, C)
    x_pad = jnp.pad(x_nhwc, ((0, 0), (1, 1), (1, 1), (0, 0)))
    shifted = [x_pad[:, i:i + H, j:j + W, :] for i in range(KH) for j in range(KW)]
    patches = jnp.stack(shifted, axis=-1)                              # (B, H, W, C, KH*KW)
    patches = patches.reshape(BP, K)                                   # col = c*9 + kh*3 + kw
    patches = jnp.pad(patches, ((0, 0), (0, K_PAD - K)))               # (B*P, K_PAD)

    w_conv_mat = w_conv.reshape(HIDDEN, K).T.astype(jnp.float32)       # (K, HIDDEN)
    w_conv_mat = jnp.pad(w_conv_mat, ((0, K_PAD - K), (0, H_PAD - HIDDEN)))
    b_conv_row = jnp.pad(b_conv.reshape(1, HIDDEN).astype(jnp.float32),
                         ((0, 0), (0, H_PAD - HIDDEN)))

    w_cls_mat = jnp.pad(w_cls.astype(jnp.float32),
                        ((0, H_PAD - HIDDEN), (0, NC_PAD - NUM_CLUSTERS)))
    b_cls_row = jnp.pad(b_cls.reshape(1, NUM_CLUSTERS).astype(jnp.float32),
                        ((0, 0), (0, NC_PAD - NUM_CLUSTERS)))

    # segment-mean matrix: pool[b, b*P:(b+1)*P] = 1/P  (mean fused into the matmul)
    row_batch = jnp.arange(BP) // P
    pool_mat = (jnp.arange(Bx)[:, None] == row_batch[None, :]).astype(jnp.float32) * (1.0 / P)

    logits_pad = pl.pallas_call(
        joint_model_kernel,
        out_shape=jax.ShapeDtypeStruct((Bx, NC_PAD), jnp.float32),
        grid_spec=pltpu.PrefetchScalarGridSpec(
            num_scalar_prefetch=0,
            grid=(1,),                                   # single fused invocation
            in_specs=[
                pl.BlockSpec((BP, K_PAD), lambda i: (0, 0)),
                pl.BlockSpec((K_PAD, H_PAD), lambda i: (0, 0)),
                pl.BlockSpec((1, H_PAD), lambda i: (0, 0)),
                pl.BlockSpec((Bx, BP), lambda i: (0, 0)),
                pl.BlockSpec((H_PAD, NC_PAD), lambda i: (0, 0)),
                pl.BlockSpec((1, NC_PAD), lambda i: (0, 0)),
            ],
            out_specs=pl.BlockSpec((Bx, NC_PAD), lambda i: (0, 0)),
        ),
        compiler_params=pltpu.CompilerParams(
            dimension_semantics=("arbitrary",)),
    )(patches, w_conv_mat, b_conv_row, pool_mat, w_cls_mat, b_cls_row)

    # JointModel.forward returns (classifier(encoder(x)), None)
    return logits_pad[:, :NUM_CLUSTERS], None


joint_model_forward = jax.jit(_joint_model_forward_impl)


# ---------------- pure-JAX reference for verification ----------------
def reference_forward(x, w_conv, b_conv, w_cls, b_cls):
    out = jax.lax.conv_general_dilated(
        x, w_conv, window_strides=(1, 1), padding="SAME",
        dimension_numbers=("NCHW", "OIHW", "NCHW"))
    out = jnp.maximum(out + b_conv.reshape(1, HIDDEN, 1, 1), 0.0)
    z = jnp.mean(out, axis=(2, 3))                         # (B, HIDDEN)
    return z @ w_cls + b_cls                               # (B, NUM_CLUSTERS)


if __name__ == "__main__":
    key = jax.random.PRNGKey(0)
    kx, kwc, kbc, kwl, kbl = jax.random.split(key, 5)

    x = jax.random.normal(kx, (B, C, H, W), dtype=jnp.float32)
    # deterministic synthetic parameters (shapes match nn.Conv2d / nn.Linear)
    w_conv = 0.1 * jax.random.normal(kwc, (HIDDEN, C, KH, KW), dtype=jnp.float32)
    b_conv = 0.01 * jax.random.normal(kbc, (HIDDEN,), dtype=jnp.float32)
    w_cls = 0.1 * jax.random.normal(kwl, (HIDDEN, NUM_CLUSTERS), dtype=jnp.float32)
    b_cls = 0.01 * jax.random.normal(kbl, (NUM_CLUSTERS,), dtype=jnp.float32)

    logits, aux = joint_model_forward(x, w_conv, b_conv, w_cls, b_cls)
    logits = jax.block_until_ready(logits)

    ref = reference_forward(x, w_conv, b_conv, w_cls, b_cls)
    assert aux is None
    assert logits.shape == (B, NUM_CLUSTERS)
    assert jnp.allclose(logits, ref, atol=1e-4, rtol=1e-4), (
        f"mismatch: max abs err {jnp.max(jnp.abs(logits - ref))}")

    print("KERNEL_OK")
</pallas_src>

<mosaic_0001>
module attributes {stable_mosaic.version = 11 : i64} {
  func.func @joint_model_kernel(%arg0: i32, %arg1: memref<512x128xf32, #tpu.memory_space<vmem>>, %arg2: memref<128x128xf32, #tpu.memory_space<vmem>>, %arg3: memref<1x128xf32, #tpu.memory_space<vmem>>, %arg4: memref<2x512xf32, #tpu.memory_space<vmem>>, %arg5: memref<128x128xf32, #tpu.memory_space<vmem>>, %arg6: memref<1x128xf32, #tpu.memory_space<vmem>>, %arg7: memref<2x128xf32, #tpu.memory_space<vmem>>) attributes {dimension_semantics = [#tpu.dimension_semantics<arbitrary>], iteration_bounds = array<i64: 1>, scalar_prefetch = 0 : i64, scratch_operands = 0 : i64, tpu.core_type = #tpu.core_type<tc>, window_params = [{pipeline_mode = #tpu.pipeline_mode<synchronous>, transform_indices = @transform_0, window_bounds = array<i64: 512, 128>}, {pipeline_mode = #tpu.pipeline_mode<synchronous>, transform_indices = @transform_1, window_bounds = array<i64: 128, 128>}, {pipeline_mode = #tpu.pipeline_mode<synchronous>, transform_indices = @transform_2, window_bounds = array<i64: 1, 128>}, {pipeline_mode = #tpu.pipeline_mode<synchronous>, transform_indices = @transform_3, window_bounds = array<i64: 2, 512>}, {pipeline_mode = #tpu.pipeline_mode<synchronous>, transform_indices = @transform_4, window_bounds = array<i64: 128, 128>}, {pipeline_mode = #tpu.pipeline_mode<synchronous>, transform_indices = @transform_5, window_bounds = array<i64: 1, 128>}, {pipeline_mode = #tpu.pipeline_mode<synchronous>, transform_indices = @transform_6, window_bounds = array<i64: 2, 128>}]} {
    %c0 = arith.constant 0 : index
    %c0_0 = arith.constant 0 : index
    %0 = vector.load %arg1[%c0, %c0_0] : memref<512x128xf32, #tpu.memory_space<vmem>>, vector<512x128xf32>
    %c0_1 = arith.constant 0 : index
    %c0_2 = arith.constant 0 : index
    %1 = vector.load %arg2[%c0_1, %c0_2] : memref<128x128xf32, #tpu.memory_space<vmem>>, vector<128x128xf32>
    %cst = arith.constant dense<0.000000e+00> : vector<512x128xf32>
    %2 = tpu.matmul %0, %1, %cst {dimension_numbers = #tpu.dot_dimension_numbers<[1], [0], [0], [1], [0, 0, 1, 1], [], []>} : vector<512x128xf32>, vector<128x128xf32>, vector<512x128xf32> -> vector<512x128xf32>
    %c0_3 = arith.constant 0 : index
    %c0_4 = arith.constant 0 : index
    %3 = vector.load %arg3[%c0_3, %c0_4] : memref<1x128xf32, #tpu.memory_space<vmem>>, vector<1x128xf32>
    %4 = vector.broadcast %3 : vector<1x128xf32> to vector<512x128xf32>
    %5 = arith.addf %2, %4 : vector<512x128xf32>
    %cst_5 = arith.constant 0.000000e+00 : f32
    %6 = vector.broadcast %cst_5 : f32 to vector<512x128xf32>
    %7 = arith.maximumf %5, %6 : vector<512x128xf32>
    %c0_6 = arith.constant 0 : index
    %c0_7 = arith.constant 0 : index
    %8 = vector.load %arg4[%c0_6, %c0_7] : memref<2x512xf32, #tpu.memory_space<vmem>>, vector<2x512xf32>
    %cst_8 = arith.constant dense<0.000000e+00> : vector<2x128xf32>
    %9 = tpu.matmul %8, %7, %cst_8 {dimension_numbers = #tpu.dot_dimension_numbers<[1], [0], [0], [1], [0, 0, 1, 1], [], []>} : vector<2x512xf32>, vector<512x128xf32>, vector<2x128xf32> -> vector<2x128xf32>
    %c0_9 = arith.constant 0 : index
    %c0_10 = arith.constant 0 : index
    %10 = vector.load %arg5[%c0_9, %c0_10] : memref<128x128xf32, #tpu.memory_space<vmem>>, vector<128x128xf32>
    %cst_11 = arith.constant dense<0.000000e+00> : vector<2x128xf32>
    %11 = tpu.matmul %9, %10, %cst_11 {dimension_numbers = #tpu.dot_dimension_numbers<[1], [0], [0], [1], [0, 0, 1, 1], [], []>} : vector<2x128xf32>, vector<128x128xf32>, vector<2x128xf32> -> vector<2x128xf32>
    %c0_12 = arith.constant 0 : index
    %c0_13 = arith.constant 0 : index
    %12 = vector.load %arg6[%c0_12, %c0_13] : memref<1x128xf32, #tpu.memory_space<vmem>>, vector<1x128xf32>
    %13 = vector.broadcast %12 : vector<1x128xf32> to vector<2x128xf32>
    %14 = arith.addf %11, %13 : vector<2x128xf32>
    %c0_14 = arith.constant 0 : index
    %c0_15 = arith.constant 0 : index
    %15 = vector.load %arg7[%c0_14, %c0_15] : memref<2x128xf32, #tpu.memory_space<vmem>>, vector<2x128xf32>
    tpu.vector_store %arg7[%c0_14, %c0_15], %14 {strides = array<i32>} : memref<2x128xf32, #tpu.memory_space<vmem>>, vector<2x128xf32>,
    return
  }
  func.func @transform_0(%arg0: i32) -> (i32, i32) {
    %c0_i32 = arith.constant 0 : i32
    %c0_i32_0 = arith.constant 0 : i32
    %c0_i32_1 = arith.constant 0 : i32
    return %c0_i32, %c0_i32_0 : i32, i32
  }
  func.func @transform_1(%arg0: i32) -> (i32, i32) {
    %c0_i32 = arith.constant 0 : i32
    %c0_i32_0 = arith.constant 0 : i32
    %c0_i32_1 = arith.constant 0 : i32
    return %c0_i32, %c0_i32_0 : i32, i32
  }
  func.func @transform_2(%arg0: i32) -> (i32, i32) {
    %c0_i32 = arith.constant 0 : i32
    %c0_i32_0 = arith.constant 0 : i32
    %c0_i32_1 = arith.constant 0 : i32
    return %c0_i32, %c0_i32_0 : i32, i32
  }
  func.func @transform_3(%arg0: i32) -> (i32, i32) {
    %c0_i32 = arith.constant 0 : i32
    %c0_i32_0 = arith.constant 0 : i32
    %c0_i32_1 = arith.constant 0 : i32
    return %c0_i32, %c0_i32_0 : i32, i32
  }
  func.func @transform_4(%arg0: i32) -> (i32, i32) {
    %c0_i32 = arith.constant 0 : i32
    %c0_i32_0 = arith.constant 0 : i32
    %c0_i32_1 = arith.constant 0 : i32
    return %c0_i32, %c0_i32_0 : i32, i32
  }
  func.func @transform_5(%arg0: i32) -> (i32, i32) {
    %c0_i32 = arith.constant 0 : i32
    %c0_i32_0 = arith.constant 0 : i32
    %c0_i32_1 = arith.constant 0 : i32
    return %c0_i32, %c0_i32_0 : i32, i32
  }
  func.func @transform_6(%arg0: i32) -> (i32, i32) {
    %c0_i32 = arith.constant 0 : i32
    %c0_i32_0 = arith.constant 0 : i32
    %c0_i32_1 = arith.constant 0 : i32
    return %c0_i32, %c0_i32_0 : i32, i32
  }
}

</mosaic_0001>

<bundles_post_ra>
// kernel: _joint_model_forward_impl.1
= control target key start
LH: loop header
LB: loop body
LE: loop exit
PB: predicated region body
PF: predicated region fallthrough
CT: control target
= control target key end

     0   :  { %s1701_s0 = inlined_call_operand.vmem [shape: f32[512,128], index: 0, kind: input, shape index: {}]   ;;  %s1702_s1 = inlined_call_operand.vmem [shape: f32[128,128], index: 1, kind: input, shape index: {}]   ;;  %s1703_s2 = inlined_call_operand.vmem [shape: f32[1,128], index: 2, kind: input, shape index: {}]   ;;  %s1704_s3 = inlined_call_operand.vmem [shape: f32[2,512], index: 3, kind: input, shape index: {}]   ;;  %s1705_s4 = inlined_call_operand.vmem [shape: f32[128,128], index: 4, kind: input, shape index: {}]   ;;  %s1706_s5 = inlined_call_operand.vmem [shape: f32[1,128], index: 5, kind: input, shape index: {}]   ;;  %s1707_s6 = inlined_call_operand.hbm [shape: f32[2,128], index: 6, kind: output, shape index: {}]  }
   0x1   :  { %v103_v0 = vld [vmem:[%s1702_s1 + $0x78] sm:$0xff]  ;;  %v102_v1 = vld [vmem:[%s1702_s1 + $0x70] sm:$0xff]  ;;  %v101_v2 = vld [vmem:[%s1702_s1 + $0x68] sm:$0xff] }
   0x2   :  { %1000 = vmatprep.subr.mxu0 %v103_v0  ;;  %v100_v3 = vld [vmem:[%s1702_s1 + $0x60] sm:$0xff]  ;;  %v99_v5 = vld [vmem:[%s1702_s1 + $0x58] sm:$0xff]  ;;  %v98_v6 = vld [vmem:[%s1702_s1 + $0x50] sm:$0xff] }
   0x3   :  { %1001 = vmatpush3.msra.mxu0 %v103_v0  ;;  %v24_v4 = vld [vmem:[%s1701_s0] sm:$0xff]  ;;  %v97_v7 = vld [vmem:[%s1702_s1 + $0x48] sm:$0xff]  ;;  %v95_v9 = vld [vmem:[%s1702_s1 + $0x38] sm:$0xff] }
   0x4   :  { %1002 = vmatprep.subr.mxu0 %v102_v1  ;;  %1032 = vmatprep.mubr.f32.mxu0 %v24_v4  ;;  %v96_v8 = vld [vmem:[%s1702_s1 + $0x40] sm:$0xff]  ;;  %v94_v10 = vld [vmem:[%s1702_s1 + $0x30] sm:$0xff]  ;;  %v93_v11 = vld [vmem:[%s1702_s1 + $0x28] sm:$0xff] }
   0x5   :  { %1003 = vmatpush3.msra.mxu0 %v102_v1  ;;  %v92_v12 = vld [vmem:[%s1702_s1 + $0x20] sm:$0xff]  ;;  %v91_v13 = vld [vmem:[%s1702_s1 + $0x18] sm:$0xff]  ;;  %v90_v14 = vld [vmem:[%s1702_s1 + $0x10] sm:$0xff] }
   0x6   :  { %1004 = vmatprep.subr.mxu0 %v101_v2  ;;  %v89_v15 = vld [vmem:[%s1702_s1 + $0x8] sm:$0xff] }
   0x7   :  { %1005 = vmatpush3.msra.mxu0 %v101_v2 }
   0x8   :  { %1006 = vmatprep.subr.mxu0 %v100_v3 }
   0x9   :  { %1007 = vmatpush3.msra.mxu0 %v100_v3 }
   0xa   :  { %1008 = vmatprep.subr.mxu0 %v99_v5 }
   0xb   :  { %1009 = vmatpush3.msra.mxu0 %v99_v5 }
   0xc   :  { %1010 = vmatprep.subr.mxu0 %v98_v6 }
   0xd   :  { %1011 = vmatpush3.msra.mxu0 %v98_v6 }
   0xe   :  { %1012 = vmatprep.subr.mxu0 %v97_v7 }
   0xf   :  { %1013 = vmatpush3.msra.mxu0 %v97_v7 }
  0x10   :  { %1014 = vmatprep.subr.mxu0 %v96_v8 }
  0x11   :  { %1015 = vmatpush3.msra.mxu0 %v96_v8 }
  0x12   :  { %1016 = vmatprep.subr.mxu0 %v95_v9 }
  0x13   :  { %1017 = vmatpush3.msra.mxu0 %v95_v9 }
  0x14   :  { %1018 = vmatprep.subr.mxu0 %v94_v10 }
  0x15   :  { %1019 = vmatpush3.msra.mxu0 %v94_v10 }
  0x16   :  { %1020 = vmatprep.subr.mxu0 %v93_v11 }
  0x17   :  { %1021 = vmatpush3.msra.mxu0 %v93_v11 }
  0x18   :  { %1022 = vmatprep.subr.mxu0 %v92_v12 }
  0x19   :  { %1023 = vmatpush3.msra.mxu0 %v92_v12 }
  0x1a   :  { %1024 = vmatprep.subr.mxu0 %v91_v13 }
  0x1b   :  { %1025 = vmatpush3.msra.mxu0 %v91_v13 }
  0x1c   :  { %11 = vsyncpa [#allocation3], 0  ;;  %1026 = vmatprep.subr.mxu0 %v90_v14  ;;  %v88_v16 = vld [vmem:[%s1702_s1] sm:$0xff]  ;;  %v25_v17 = vld [vmem:[%s1701_s0 + $0x8] sm:$0xff]  ;;  %vm1192_vm0 = vmmov 0   ;;  %s1193_s14 = smov [#allocation2]  }
  0x1d   :  { %1027 = vmatpush3.msra.mxu0 %v90_v14  ;;  %v26_v18 = vld [vmem:[%s1701_s0 + $0x10] sm:$0xff]  ;;  %v27_v19 = vld [vmem:[%s1701_s0 + $0x18] sm:$0xff]  ;;  %v28_v20 = vld [vmem:[%s1701_s0 + $0x20] sm:$0xff]  ;;  %s823_s15 = sshll.u32 %s1193_s14, 4  ;;  %s824_s15 = int_to_ptr.vmem [resolvable:$true] %s823_s15 }
  0x1e   :  { %1028 = vmatprep.subr.mxu0 %v89_v15  ;;  %v29_v21 = vld [vmem:[%s1701_s0 + $0x28] sm:$0xff]  ;;  %v30_v22 = vld [vmem:[%s1701_s0 + $0x30] sm:$0xff]  ;;  %v31_v23 = vld [vmem:[%s1701_s0 + $0x38] sm:$0xff]  ;;  %p1173_p1 = scmp.lt.s32.totalorder %s824_s15, %s824_s15 }
  0x1f   :  { %1029 = vmatpush3.msra.mxu0 %v89_v15  ;;  %v32_v24 = vld [vmem:[%s1701_s0 + $0x40] sm:$0xff]  ;;  %v33_v25 = vld [vmem:[%s1701_s0 + $0x48] sm:$0xff]  ;;  %v34_v26 = vld [vmem:[%s1701_s0 + $0x50] sm:$0xff] }
  0x20   :  { %1030 = vmatprep.subr.mxu0 %v88_v16  ;;  %v35_v27 = vld [vmem:[%s1701_s0 + $0x58] sm:$0xff]  ;;  %v36_v28 = vld [vmem:[%s1701_s0 + $0x60] sm:$0xff]  ;;  %v37_v29 = vld [vmem:[%s1701_s0 + $0x68] sm:$0xff] }
  0x21   :  { %1031 = vmatpush3.msra.mxu0 %v88_v16  ;;  %v38_v30 = vld [vmem:[%s1701_s0 + $0x70] sm:$0xff]  ;;  %v39_v31 = vld [vmem:[%s1701_s0 + $0x78] sm:$0xff]  ;;  %v40_v32 = vld [vmem:[%s1701_s0 + $0x80] sm:$0xff]  ;;  %v1190_v16 = vmov 1983009808  }
  0x22   :  { %1033 = vmatmul.mubr.f32.vlgmr.msra.gmra.mxu0 %v25_v17  ;;  %v41_v33 = vld [vmem:[%s1701_s0 + $0x88] sm:$0xff]  ;;  %v42_v34 = vld [vmem:[%s1701_s0 + $0x90] sm:$0xff]  ;;  %v43_v35 = vld [vmem:[%s1701_s0 + $0x98] sm:$0xff]  ;;  %v564_v17 = vunpack.c.l.s4 %v1190_v16 }
  0x23   :  { %1035 = vmatprep.mubr.f32.mxu0 %v26_v18  ;;  %v44_v36 = vld [vmem:[%s1701_s0 + $0xa0] sm:$0xff]  ;;  %v45_v37 = vld [vmem:[%s1701_s0 + $0xa8] sm:$0xff]  ;;  %v46_v38 = vld [vmem:[%s1701_s0 + $0xb0] sm:$0xff]  ;;  %v566_v18 = vlaneseq }
  0x24   :  { %v47_v39 = vld [vmem:[%s1701_s0 + $0xb8] sm:$0xff]  ;;  %v48_v40 = vld [vmem:[%s1701_s0 + $0xc0] sm:$0xff]  ;;  %v49_v41 = vld [vmem:[%s1701_s0 + $0xc8] sm:$0xff] }
  0x25   :  { %v50_v42 = vld [vmem:[%s1701_s0 + $0xd0] sm:$0xff]  ;;  %v51_v43 = vld [vmem:[%s1701_s0 + $0xd8] sm:$0xff]  ;;  %v52_v44 = vld [vmem:[%s1701_s0 + $0xe0] sm:$0xff] }
  0x26   :  { %1036 = vmatmul.mubr.f32.gmra.mxu0 %v27_v19  ;;  %v53_v45 = vld [vmem:[%s1701_s0 + $0xe8] sm:$0xff]  ;;  %v54_v46 = vld [vmem:[%s1701_s0 + $0xf0] sm:$0xff]  ;;  %v55_v47 = vld [vmem:[%s1701_s0 + $0xf8] sm:$0xff]  ;;  %v565_v19 = vunpack.c.0.s8 %v564_v17 }
  0x27   :  { %1038 = vmatprep.mubr.f32.mxu0 %v28_v20  ;;  %v56_v48 = vld [vmem:[%s1701_s0 + $0x100] sm:$0xff]  ;;  %v57_v49 = vld [vmem:[%s1701_s0 + $0x108] sm:$0xff]  ;;  %v58_v50 = vld [vmem:[%s1701_s0 + $0x110] sm:$0xff]  ;;  %v567_v20 = vshrl.u32 %v566_v18, 7 }
  0x28   :  { %v59_v51 = vld [vmem:[%s1701_s0 + $0x118] sm:$0xff]  ;;  %v60_v52 = vld [vmem:[%s1701_s0 + $0x120] sm:$0xff]  ;;  %v61_v53 = vld [vmem:[%s1701_s0 + $0x128] sm:$0xff] }
  0x29   :  { %v62_v54 = vld [vmem:[%s1701_s0 + $0x130] sm:$0xff]  ;;  %v63_v55 = vld [vmem:[%s1701_s0 + $0x138] sm:$0xff]  ;;  %v64_v56 = vld [vmem:[%s1701_s0 + $0x140] sm:$0xff] }
  0x2a   :  { %1039 = vmatmul.mubr.f32.gmra.mxu0 %v29_v21  ;;  %v65_v57 = vld [vmem:[%s1701_s0 + $0x148] sm:$0xff]  ;;  %v66_v58 = vld [vmem:[%s1701_s0 + $0x150] sm:$0xff]  ;;  %v67_v59 = vld [vmem:[%s1701_s0 + $0x158] sm:$0xff]  ;;  %v568_v21 = vsub.s32 %v565_v19, %v567_v20 }
  0x2b   :  { %1041 = vmatprep.mubr.f32.mxu0 %v30_v22  ;;  %v68_v60 = vld [vmem:[%s1701_s0 + $0x160] sm:$0xff]  ;;  %v69_v61 = vld [vmem:[%s1701_s0 + $0x168] sm:$0xff]  ;;  %v70_v62 = vld [vmem:[%s1701_s0 + $0x170] sm:$0xff] }
  0x2c   :  { %v71_v63 = vld [vmem:[%s1701_s0 + $0x178] sm:$0xff]  ;;  %v72_v0 = vld [vmem:[%s1701_s0 + $0x180] sm:$0xff]  ;;  %v73_v1 = vld [vmem:[%s1701_s0 + $0x188] sm:$0xff] }
  0x2d   :  { %v74_v2 = vld [vmem:[%s1701_s0 + $0x190] sm:$0xff]  ;;  %v75_v3 = vld [vmem:[%s1701_s0 + $0x198] sm:$0xff]  ;;  %v76_v4 = vld [vmem:[%s1701_s0 + $0x1a0] sm:$0xff] }
  0x2e   :  { %1042 = vmatmul.mubr.f32.gmra.mxu0 %v31_v23  ;;  %v77_v5 = vld [vmem:[%s1701_s0 + $0x1a8] sm:$0xff]  ;;  %v78_v6 = vld [vmem:[%s1701_s0 + $0x1b0] sm:$0xff]  ;;  %v79_v7 = vld [vmem:[%s1701_s0 + $0x1b8] sm:$0xff] }
  0x2f   :  { %1044 = vmatprep.mubr.f32.mxu0 %v32_v24  ;;  %v80_v8 = vld [vmem:[%s1701_s0 + $0x1c0] sm:$0xff]  ;;  %v81_v9 = vld [vmem:[%s1701_s0 + $0x1c8] sm:$0xff]  ;;  %v82_v10 = vld [vmem:[%s1701_s0 + $0x1d0] sm:$0xff] }
  0x30   :  { %v83_v11 = vld [vmem:[%s1701_s0 + $0x1d8] sm:$0xff]  ;;  %v84_v12 = vld [vmem:[%s1701_s0 + $0x1e0] sm:$0xff]  ;;  %v85_v13 = vld [vmem:[%s1701_s0 + $0x1e8] sm:$0xff] }
  0x31   :  { %v86_v14 = vld [vmem:[%s1701_s0 + $0x1f0] sm:$0xff]  ;;  %v87_v15 = vld [vmem:[%s1701_s0 + $0x1f8] sm:$0xff]  ;;  %v560_v22 = vld [vmem:[%s1704_s3] sm:$0xff] }
  0x32   :  { %1045 = vmatmul.mubr.f32.gmra.mxu0 %v33_v25  ;;  %v1472_v23 = vrot.slane %v560_v22, %v568_v21 }
  0x33   :  { %1047 = vmatprep.mubr.f32.mxu0 %v34_v26 }
  0x34   :  { %v577_v24 = vcombine.high %v1472_v23, %v1472_v23 }
  0x36   :  { %1048 = vmatmul.mubr.f32.gmra.mxu0 %v35_v27  ;;  %647 = vmatprep.mubr.f32.mxu1 %v577_v24 }
  0x37   :  { %1050 = vmatprep.mubr.f32.mxu0 %v36_v28 }
  0x3a   :  { %1051 = vmatmul.mubr.f32.gmra.mxu0 %v37_v29 }
  0x3b   :  { %1053 = vmatprep.mubr.f32.mxu0 %v38_v30 }
  0x3e   :  { %1054 = vmatmul.mubr.f32.gmra.mxu0 %v39_v31 }
  0x3f   :  { %1056 = vmatprep.mubr.f32.mxu0 %v40_v32 }
  0x42   :  { %1057 = vmatmul.mubr.f32.gmra.mxu0 %v41_v33 }
  0x43   :  { %1059 = vmatprep.mubr.f32.mxu0 %v42_v34 }
  0x46   :  { %1060 = vmatmul.mubr.f32.gmra.mxu0 %v43_v35 }
  0x47   :  { %1062 = vmatprep.mubr.f32.mxu0 %v44_v36 }
  0x4a   :  { %1063 = vmatmul.mubr.f32.gmra.mxu0 %v45_v37 }
  0x4b   :  { %1065 = vmatprep.mubr.f32.mxu0 %v46_v38  ;;  %v562_v38 = vcombine.high %v560_v22, %v560_v22 }
  0x4e   :  { %1066 = vmatmul.mubr.f32.gmra.mxu0 %v47_v39 }
  0x4f   :  { %1068 = vmatprep.mubr.f32.mxu0 %v48_v40 }
  0x52   :  { %1069 = vmatmul.mubr.f32.gmra.mxu0 %v49_v41  ;;  %v1494_v41 = vrot.slane %v562_v38, %v568_v21 }
  0x53   :  { %1071 = vmatprep.mubr.f32.mxu0 %v50_v42 }
  0x56   :  { %1072 = vmatmul.mubr.f32.gmra.mxu0 %v51_v43 }
  0x57   :  { %1074 = vmatprep.mubr.f32.mxu0 %v52_v44 }
  0x5a   :  { %1075 = vmatmul.mubr.f32.gmra.mxu0 %v53_v45 }
  0x5b   :  { %1077 = vmatprep.mubr.f32.mxu0 %v54_v46 }
  0x5e   :  { %1078 = vmatmul.mubr.f32.gmra.mxu0 %v55_v47 }
  0x5f   :  { %1080 = vmatprep.mubr.f32.mxu0 %v56_v48 }
  0x62   :  { %1081 = vmatmul.mubr.f32.gmra.mxu0 %v57_v49 }
  0x63   :  { %1083 = vmatprep.mubr.f32.mxu0 %v58_v50 }
  0x66   :  { %1084 = vmatmul.mubr.f32.gmra.mxu0 %v59_v51 }
  0x67   :  { %1086 = vmatprep.mubr.f32.mxu0 %v60_v52 }
  0x6a   :  { %1087 = vmatmul.mubr.f32.gmra.mxu0 %v61_v53 }
  0x6b   :  { %1089 = vmatprep.mubr.f32.mxu0 %v62_v54 }
  0x6e   :  { %1090 = vmatmul.mubr.f32.gmra.mxu0 %v63_v55 }
  0x6f   :  { %1092 = vmatprep.mubr.f32.mxu0 %v64_v56 }
  0x72   :  { %1093 = vmatmul.mubr.f32.gmra.mxu0 %v65_v57  ;;  %v1511_v57 = vld [vmem:[%s1703_s2] ss:$0 sm:$0xff] }
  0x73   :  { %1095 = vmatprep.mubr.f32.mxu0 %v66_v58 }
  0x76   :  { %1096 = vmatmul.mubr.f32.gmra.mxu0 %v67_v59 }
  0x77   :  { %1098 = vmatprep.mubr.f32.mxu0 %v68_v60 }
  0x7a   :  { %1099 = vmatmul.mubr.f32.gmra.mxu0 %v69_v61 }
  0x7b   :  { %1101 = vmatprep.mubr.f32.mxu0 %v70_v62 }
  0x7e   :  { %1102 = vmatmul.mubr.f32.gmra.mxu0 %v71_v63 }
  0x7f   :  { %1104 = vmatprep.mubr.f32.mxu0 %v72_v0 }
  0x82   :  { %1105 = vmatmul.mubr.f32.gmra.mxu0 %v73_v1 }
  0x83   :  { %1107 = vmatprep.mubr.f32.mxu0 %v74_v2 }
  0x86   :  { %1108 = vmatmul.mubr.f32.gmra.mxu0 %v75_v3 }
  0x87   :  { %1110 = vmatprep.mubr.f32.mxu0 %v76_v4 }
  0x8a   :  { %1111 = vmatmul.mubr.f32.gmra.mxu0 %v77_v5 }
  0x8b   :  { %1113 = vmatprep.mubr.f32.mxu0 %v78_v6 }
  0x8e   :  { %1114 = vmatmul.mubr.f32.gmra.mxu0 %v79_v7 }
  0x8f   :  { %1116 = vmatprep.mubr.f32.mxu0 %v80_v8 }
  0x92   :  { %1117 = vmatmul.mubr.f32.gmra.mxu0 %v81_v9 }
  0x93   :  { %1119 = vmatprep.mubr.f32.mxu0 %v82_v10 }
  0x96   :  { %1120 = vmatmul.mubr.f32.gmra.mxu0 %v83_v11 }
  0x97   :  { %1122 = vmatprep.mubr.f32.mxu0 %v84_v12 }
  0x9a   :  { %1123 = vmatmul.mubr.f32.gmra.mxu0 %v85_v13 }
  0x9b   :  { %1125 = vmatprep.mubr.f32.mxu0 %v86_v14 }
  0x9e   :  { %1126 = vmatmul.mubr.f32.gmra.mxu0 %v87_v15 }
  0xe2   :  { %v1476_v25 = vpop.f32.mrf.mxu0 }
  0xe4   :  { %v1478_v26 = vpop.f32.mrf.mxu0 }
  0xe6   :  { %v1480_v27 = vpop.f32.mrf.mxu0 }
  0xe8   :  { %v1482_v28 = vpop.f32.mrf.mxu0 }
  0xea   :  { %v1484_v29 = vpop.f32.mrf.mxu0 }
  0xec   :  { %v1486_v30 = vpop.f32.mrf.mxu0 }
  0xee   :  { %v1488_v31 = vpop.f32.mrf.mxu0 }
  0xf0   :  { %v1490_v32 = vpop.f32.mrf.mxu0 }
  0xf2   :  { %v1046_v33 = vpop.f32.mrf.mxu0 }
  0xf3   :  { %v223_v22 = vadd.f32 %v1046_v33, %v1511_v57  ;;  %v213_v33 = vadd.f32 %v1488_v31, %v1511_v57  ;;  %v203_v31 = vadd.f32 %v1484_v29, %v1511_v57 }
  0xf4   :  { %v1492_v34 = vpop.f32.mrf.mxu0 }
  0xf6   :  { %v1049_v35 = vpop.f32.mrf.mxu0 }
  0xf7   :  { %v233_v12 = vadd.f32 %v1049_v35, %v1511_v57 }
  0xf8   :  { %v227_v36 = vpop.f32.mrf.mxu0 }
  0xf9   :  { %v228_v17 = vadd.f32 %v1511_v57, %v227_v36  ;;  %v507_v24 = vmax.f32 %v233_v12, 0.0  ;;  %v218_v36 = vadd.f32 %v1511_v57, %v1492_v34  ;;  %v208_v34 = vadd.f32 %v1511_v57, %v1490_v32 }
  0xfa   :  { %v1052_v37 = vpop.f32.mrf.mxu0 }
  0xfb   :  { %v243_v2 = vadd.f32 %v1052_v37, %v1511_v57 }
  0xfc   :  { %v237_v39 = vpop.f32.mrf.mxu0 }
  0xfd   :  { %v238_v7 = vadd.f32 %v1511_v57, %v237_v39  ;;  %v509_v13 = vmax.f32 %v243_v2, 0.0  ;;  %v506_v39 = vmax.f32 %v228_v17, 0.0  ;;  %v501_v2 = vmax.f32 %v203_v31, 0.0 }
  0xfe   :  { %v1055_v40 = vpop.f32.mrf.mxu0 }
  0xff   :  { %v253_v58 = vadd.f32 %v1055_v40, %v1511_v57  ;;  %v508_v18 = vmax.f32 %v238_v7, 0.0 }
 0x100   :  { %v247_v42 = vpop.f32.mrf.mxu0 }
 0x101   :  { %v248_v61 = vadd.f32 %v1511_v57, %v247_v42  ;;  %v511_v3 = vmax.f32 %v253_v58, 0.0 }
 0x102   :  { %v1496_v43 = vpop.f32.mrf.mxu0 }
 0x103   :  { %v510_v8 = vmax.f32 %v248_v61, 0.0 }
 0x104   :  { %v1498_v44 = vpop.f32.mrf.mxu0 }
 0x106   :  { %v1500_v45 = vpop.f32.mrf.mxu0 }
 0x108   :  { %v1502_v46 = vpop.f32.mrf.mxu0 }
 0x10a   :  { %v1504_v47 = vpop.f32.mrf.mxu0 }
 0x10c   :  { %v1506_v48 = vpop.f32.mrf.mxu0 }
 0x10e   :  { %v1067_v49 = vpop.f32.mrf.mxu0 }
 0x10f   :  { %v293_v42 = vadd.f32 %v1067_v49, %v1511_v57  ;;  %v283_v49 = vadd.f32 %v1504_v47, %v1511_v57  ;;  %v273_v47 = vadd.f32 %v1500_v45, %v1511_v57  ;;  %v263_v45 = vadd.f32 %v1496_v43, %v1511_v57 }
 0x110   :  { %v287_v50 = vpop.f32.mrf.mxu0 }
 0x111   :  { %v517_v29 = vmax.f32 %v283_v49, 0.0  ;;  %v513_v43 = vmax.f32 %v263_v45, 0.0 }
 0x112   :  { %v1070_v51 = vpop.f32.mrf.mxu0 }
 0x113   :  { %v303_v20 = vadd.f32 %v1070_v51, %v1511_v57 }
 0x114   :  { %v297_v52 = vpop.f32.mrf.mxu0 }
 0x115   :  { %v298_v37 = vadd.f32 %v1511_v57, %v297_v52  ;;  %v521_v51 = vmax.f32 %v303_v20, 0.0  ;;  %v288_v52 = vadd.f32 %v1511_v57, %v287_v50  ;;  %v278_v50 = vadd.f32 %v1511_v57, %v1506_v48 }
 0x116   :  { %v1073_v53 = vpop.f32.mrf.mxu0  ;;  %v268_v48 = vadd.f32 %v1511_v57, %v1502_v46  ;;  %v258_v46 = vadd.f32 %v1511_v57, %v1498_v44  ;;  %v578_v44 = vcombine.high %v1494_v41, %v1494_v41 }
 0x117   :  { %v313_v10 = vadd.f32 %v1073_v53, %v1511_v57  ;;  %v505_v53 = vmax.f32 %v223_v22, 0.0  ;;  %v518_v32 = vmax.f32 %v288_v52, 0.0 }
 0x118   :  { %v307_v54 = vpop.f32.mrf.mxu0  ;;  %v514_v12 = vmax.f32 %v268_v48, 0.0 }
 0x119   :  { %v308_v15 = vadd.f32 %v1511_v57, %v307_v54  ;;  %v523_v21 = vmax.f32 %v313_v10, 0.0 }
 0x11a   :  { %v1076_v55 = vpop.f32.mrf.mxu0 }
 0x11b   :  { %v323_v63 = vadd.f32 %v1076_v55, %v1511_v57  ;;  %v522_v38 = vmax.f32 %v308_v15, 0.0  ;;  %v520_v55 = vmax.f32 %v298_v37, 0.0 }
 0x11c   :  { %v317_v56 = vpop.f32.mrf.mxu0 }
 0x11d   :  { %v318_v5 = vadd.f32 %v1511_v57, %v317_v56  ;;  %v525_v11 = vmax.f32 %v323_v63, 0.0  ;;  %v504_v56 = vmax.f32 %v218_v36, 0.0  ;;  %v502_v63 = vmax.f32 %v208_v34, 0.0 }
 0x11e   :  { %v1079_v59 = vpop.f32.mrf.mxu0 }
 0x11f   :  { %v333_v60 = vadd.f32 %v1079_v59, %v1511_v57  ;;  %v524_v16 = vmax.f32 %v318_v5, 0.0  ;;  %v519_v59 = vmax.f32 %v293_v42, 0.0  ;;  %v188_v5 = vadd.f32 %v1511_v57, %v1482_v28 }
 0x120   :  { %v327_v62 = vpop.f32.mrf.mxu0  ;;  %v178_v28 = vadd.f32 %v1511_v57, %v1478_v26 }
 0x121   :  { %v328_v0 = vadd.f32 %v1511_v57, %v327_v62  ;;  %v527_v1 = vmax.f32 %v333_v60, 0.0  ;;  %v503_v60 = vmax.f32 %v213_v33, 0.0  ;;  %v198_v62 = vadd.f32 %v1511_v57, %v1486_v30 }
 0x122   :  { %v1519_v4 = vpop.f32.mrf.mxu0  ;;  %v516_v30 = vmax.f32 %v278_v50, 0.0 }
 0x123   :  { %v526_v6 = vmax.f32 %v328_v0, 0.0  ;;  %913 = vmatprep.subr.mxu1 %v527_v1  ;;  %v193_v1 = vadd.f32 %v1480_v27, %v1511_v57  ;;  %v515_v27 = vmax.f32 %v273_v47, 0.0 }
 0x124   :  { %v1523_v9 = vpop.f32.mrf.mxu0  ;;  %914 = vmatpush3.msra.mxu1 %v511_v3 }
 0x125   :  { %915 = vmatprep.subr.mxu1 %v526_v6  ;;  %v500_v6 = vmax.f32 %v198_v62, 0.0  ;;  %v499_v10 = vmax.f32 %v193_v1, 0.0 }
 0x126   :  { %v1527_v14 = vpop.f32.mrf.mxu0  ;;  %916 = vmatpush3.msra.mxu1 %v510_v8  ;;  %v183_v8 = vadd.f32 %v1476_v25, %v1511_v57  ;;  %v512_v25 = vmax.f32 %v258_v46, 0.0 }
 0x127   :  { %917 = vmatprep.subr.mxu1 %v525_v11 }
 0x128   :  { %v1531_v19 = vpop.f32.mrf.mxu0  ;;  %918 = vmatpush3.msra.mxu1 %v509_v13  ;;  %v498_v13 = vmax.f32 %v188_v5, 0.0 }
 0x129   :  { %919 = vmatprep.subr.mxu1 %v524_v16  ;;  %v497_v16 = vmax.f32 %v183_v8, 0.0 }
 0x12a   :  { %v1535_v35 = vpop.f32.mrf.mxu0  ;;  %920 = vmatpush3.msra.mxu1 %v508_v18  ;;  %v496_v18 = vmax.f32 %v178_v28, 0.0 }
 0x12b   :  { %921 = vmatprep.subr.mxu1 %v523_v21 }
 0x12c   :  { %v1540_v40 = vpop.f32.mrf.mxu0  ;;  %922 = vmatpush3.msra.mxu1 %v507_v24 }
 0x12d   :  { %923 = vmatprep.subr.mxu1 %v522_v38 }
 0x12e   :  { %v1545_v54 = vpop.f32.mrf.mxu0  ;;  %924 = vmatpush3.msra.mxu1 %v506_v39 }
 0x12f   :  { %925 = vmatprep.subr.mxu1 %v521_v51 }
 0x130   :  { %v1550_v58 = vpop.f32.mrf.mxu0  ;;  %926 = vmatpush3.msra.mxu1 %v505_v53 }
 0x131   :  { %927 = vmatprep.subr.mxu1 %v520_v55 }
 0x132   :  { %v1556_v61 = vpop.f32.mrf.mxu0  ;;  %928 = vmatpush3.msra.mxu1 %v504_v56 }
 0x133   :  { %929 = vmatprep.subr.mxu1 %v519_v59  ;;  %v383_v46 = vadd.f32 %v1556_v61, %v1511_v57 }
 0x134   :  { %v1562_v0 = vpop.f32.mrf.mxu0  ;;  %930 = vmatpush3.msra.mxu1 %v503_v60 }
 0x135   :  { %931 = vmatprep.subr.mxu1 %v518_v32 }
 0x136   :  { %v1568_v3 = vpop.f32.mrf.mxu0  ;;  %932 = vmatpush3.msra.mxu1 %v502_v63 }
 0x137   :  { %933 = vmatprep.subr.mxu1 %v517_v29 }
 0x138   :  { %v1574_v7 = vpop.f32.mrf.mxu0  ;;  %934 = vmatpush3.msra.mxu1 %v501_v2 }
 0x139   :  { %935 = vmatprep.subr.mxu1 %v516_v30  ;;  %v393_v30 = vadd.f32 %v1568_v3, %v1511_v57 }
 0x13a   :  { %v1100_v11 = vpop.f32.mrf.mxu0  ;;  %936 = vmatpush3.msra.mxu1 %v500_v6 }
 0x13b   :  { %937 = vmatprep.subr.mxu1 %v515_v27  ;;  %v403_v32 = vadd.f32 %v1100_v11, %v1511_v57  ;;  %v388_v27 = vadd.f32 %v1511_v57, %v1574_v7 }
 0x13c   :  { %v397_v15 = vpop.f32.mrf.mxu0  ;;  %938 = vmatpush3.msra.mxu1 %v499_v10 }
 0x13d   :  { %939 = vmatprep.subr.mxu1 %v514_v12  ;;  %v398_v29 = vadd.f32 %v1511_v57, %v397_v15  ;;  %v541_v5 = vmax.f32 %v403_v32, 0.0  ;;  %v539_v12 = vmax.f32 %v393_v30, 0.0  ;;  %v538_v15 = vmax.f32 %v388_v27, 0.0  ;;  %v733_v32 = vld [vmem:[%s1705_s4 + $0x50] sm:$0xff] }
 0x13e   :  { %v1103_v17 = vpop.f32.mrf.mxu0  ;;  %940 = vmatpush3.msra.mxu1 %v498_v13  ;;  %v378_v13 = vadd.f32 %v1511_v57, %v1562_v0  ;;  %v725_v30 = vld [vmem:[%s1705_s4 + $0x10] sm:$0xff] }
 0x13f   :  { %941 = vmatprep.subr.mxu1 %v513_v43  ;;  %v540_v8 = vmax.f32 %v398_v29, 0.0  ;;  %v729_v29 = vld [vmem:[%s1705_s4 + $0x30] sm:$0xff] }
 0x140   :  { %v407_v20 = vpop.f32.mrf.mxu0  ;;  %942 = vmatpush3.msra.mxu1 %v497_v16  ;;  %v373_v16 = vadd.f32 %v1545_v54, %v1511_v57 }
 0x141   :  { %943 = vmatprep.subr.mxu1 %v512_v25  ;;  %v408_v49 = vadd.f32 %v1511_v57, %v407_v20  ;;  %v536_v20 = vmax.f32 %v378_v13, 0.0 }
 0x142   :  { %v1586_v21 = vpop.f32.mrf.mxu0  ;;  %944 = vmatpush3.msra.mxu1 %v496_v18  ;;  %v368_v18 = vadd.f32 %v1511_v57, %v1550_v58 }
 0x143   :  { %648 = vmatmul.mubr.f32.vlgmr.msra.gmra.mxu1 %v1472_v23  ;;  %v413_v23 = vadd.f32 %v1103_v17, %v1511_v57  ;;  %v542_v1 = vmax.f32 %v408_v49, 0.0  ;;  %v537_v17 = vmax.f32 %v383_v46, 0.0 }
 0x144   :  { %v1589_v26 = vpop.f32.mrf.mxu0  ;;  %717 = vmatprep.mubr.f32.mxu1 %v578_v44  ;;  %v534_v58 = vmax.f32 %v368_v18, 0.0 }
 0x145   :  { %v543_v62 = vmax.f32 %v413_v23, 0.0 }
 0x146   :  { %v1591_v22 = vpop.f32.mrf.mxu0 }
 0x148   :  { %v1593_v24 = vpop.f32.mrf.mxu0 }
 0x14a   :  { %v1112_v37 = vpop.f32.mrf.mxu0 }
 0x14b   :  { %v443_v0 = vadd.f32 %v1112_v37, %v1511_v57  ;;  %v433_v37 = vadd.f32 %v1591_v22, %v1511_v57  ;;  %v423_v22 = vadd.f32 %v1586_v21, %v1511_v57 }
 0x14c   :  { %v1595_v38 = vpop.f32.mrf.mxu0 }
 0x14d   :  { %v438_v54 = vadd.f32 %v1511_v57, %v1595_v38  ;;  %v428_v38 = vadd.f32 %v1511_v57, %v1593_v24  ;;  %v547_v23 = vmax.f32 %v433_v37, 0.0  ;;  %v418_v24 = vadd.f32 %v1511_v57, %v1589_v26 }
 0x14e   :  { %v1115_v36 = vpop.f32.mrf.mxu0  ;;  %v1191_v26 = vmov 0.0  }
 0x14f   :  { %v453_v7 = vadd.f32 %v1115_v36, %v1511_v57  ;;  %v363_v36 = vadd.f32 %v1535_v35, %v1511_v57  ;;  %v353_v35 = vadd.f32 %v1527_v14, %v1511_v57  ;;  %v343_v14 = vadd.f32 %v1519_v4, %v1511_v57  ;;  %v738_v4 = vld [vmem:[%s1705_s4 + $0x78] sm:$0xff] }
 0x150   :  { %v447_v39 = vpop.f32.mrf.mxu0 }
 0x151   :  { %v448_v61 = vadd.f32 %v1511_v57, %v447_v39  ;;  %v551_v44 = vmax.f32 %v453_v7, 0.0  ;;  %v529_v21 = vmax.f32 %v343_v14, 0.0 }
 0x152   :  { %v1118_v42 = vpop.f32.mrf.mxu0 }
 0x153   :  { %v463_v10 = vadd.f32 %v1118_v42, %v1511_v57  ;;  %v535_v42 = vmax.f32 %v373_v16, 0.0  ;;  %v550_v39 = vmax.f32 %v448_v61, 0.0 }
 0x154   :  { %v457_v51 = vpop.f32.mrf.mxu0 }
 0x155   :  { %v458_v3 = vadd.f32 %v1511_v57, %v457_v51  ;;  %v553_v43 = vmax.f32 %v463_v10, 0.0  ;;  %v358_v51 = vadd.f32 %v1511_v57, %v1540_v40  ;;  %v348_v40 = vadd.f32 %v1511_v57, %v1531_v19 }
 0x156   :  { %v1121_v33 = vpop.f32.mrf.mxu0  ;;  %v338_v19 = vadd.f32 %v1511_v57, %v1523_v9  ;;  %v736_v9 = vld [vmem:[%s1705_s4 + $0x68] sm:$0xff] }
 0x157   :  { %v473_v2 = vadd.f32 %v1121_v33, %v1511_v57  ;;  %v552_v25 = vmax.f32 %v458_v3, 0.0  ;;  %v549_v33 = vmax.f32 %v443_v0, 0.0  ;;  %v530_v49 = vmax.f32 %v348_v40, 0.0  ;;  %v832_v3 = vld [vmem:[%s1706_s5] ss:$0 sm:$0xff] }
 0x158   :  { %v467_v53 = vpop.f32.mrf.mxu0 }
 0x159   :  { %v468_v6 = vadd.f32 %v1511_v57, %v467_v53  ;;  %v555_v11 = vmax.f32 %v473_v2, 0.0  ;;  %v533_v53 = vmax.f32 %v363_v36, 0.0  ;;  %v727_v2 = vld [vmem:[%s1705_s4 + $0x20] sm:$0xff] }
 0x15a   :  { %v1124_v52 = vpop.f32.mrf.mxu0 }
 0x15b   :  { %v483_v31 = vadd.f32 %v1124_v52, %v1511_v57  ;;  %v554_v28 = vmax.f32 %v468_v6, 0.0  ;;  %v548_v52 = vmax.f32 %v438_v54, 0.0  ;;  %v723_v6 = vld [vmem:[%s1705_s4] sm:$0xff] }
 0x15c   :  { %v477_v55 = vpop.f32.mrf.mxu0 }
 0x15d   :  { %v478_v63 = vadd.f32 %v1511_v57, %v477_v55  ;;  %v557_v48 = vmax.f32 %v483_v31, 0.0  ;;  %v532_v55 = vmax.f32 %v358_v51, 0.0  ;;  %v544_v31 = vmax.f32 %v418_v24, 0.0 }
 0x15e   :  { %v1127_v34 = vpop.f32.mrf.mxu0 }
 0x15f   :  { %v493_v56 = vadd.f32 %v1127_v34, %v1511_v57  ;;  %v556_v45 = vmax.f32 %v478_v63, 0.0  ;;  %v531_v34 = vmax.f32 %v353_v35, 0.0  ;;  %v731_v63 = vld [vmem:[%s1705_s4 + $0x40] sm:$0xff] }
 0x160   :  { %v487_v59 = vpop.f32.mrf.mxu0 }
 0x161   :  { %v559_v60 = vmax.f32 %v493_v56, 0.0  ;;  %v488_v50 = vadd.f32 %v1511_v57, %v487_v59  ;;  %v546_v56 = vmax.f32 %v428_v38, 0.0  ;;  %v545_v59 = vmax.f32 %v423_v22, 0.0  ;;  %v737_v57 = vld [vmem:[%s1705_s4 + $0x70] sm:$0xff] }
 0x163   :  { %v558_v47 = vmax.f32 %v488_v50, 0.0  ;;  %948 = vmatprep.subr.mxu1 %v559_v60  ;;  %v528_v60 = vmax.f32 %v338_v19, 0.0  ;;  %v734_v50 = vld [vmem:[%s1705_s4 + $0x58] sm:$0xff] }
 0x164   :  { %949 = vmatpush3.msra.mxu1 %v543_v62  ;;  %v732_v62 = vld [vmem:[%s1705_s4 + $0x48] sm:$0xff] }
 0x165   :  { %950 = vmatprep.subr.mxu1 %v558_v47  ;;  %v730_v47 = vld [vmem:[%s1705_s4 + $0x38] sm:$0xff] }
 0x166   :  { %951 = vmatpush3.msra.mxu1 %v542_v1  ;;  %v728_v1 = vld [vmem:[%s1705_s4 + $0x28] sm:$0xff] }
 0x167   :  { %952 = vmatprep.subr.mxu1 %v557_v48  ;;  %v726_v48 = vld [vmem:[%s1705_s4 + $0x18] sm:$0xff] }
 0x168   :  { %953 = vmatpush3.msra.mxu1 %v541_v5  ;;  %v724_v5 = vld [vmem:[%s1705_s4 + $0x8] sm:$0xff] }
 0x169   :  { %954 = vmatprep.subr.mxu1 %v556_v45 }
 0x16a   :  { %955 = vmatpush3.msra.mxu1 %v540_v8 }
 0x16b   :  { %956 = vmatprep.subr.mxu1 %v555_v11 }
 0x16c   :  { %957 = vmatpush3.msra.mxu1 %v539_v12 }
 0x16d   :  { %958 = vmatprep.subr.mxu1 %v554_v28 }
 0x16e   :  { %959 = vmatpush3.msra.mxu1 %v538_v15 }
 0x16f   :  { %960 = vmatprep.subr.mxu1 %v553_v43 }
 0x170   :  { %961 = vmatpush3.msra.mxu1 %v537_v17 }
 0x171   :  { %962 = vmatprep.subr.mxu1 %v552_v25 }
 0x172   :  { %963 = vmatpush3.msra.mxu1 %v536_v20 }
 0x173   :  { %964 = vmatprep.subr.mxu1 %v551_v44 }
 0x174   :  { %965 = vmatpush3.msra.mxu1 %v535_v42 }
 0x175   :  { %966 = vmatprep.subr.mxu1 %v550_v39 }
 0x176   :  { %967 = vmatpush3.msra.mxu1 %v534_v58 }
 0x177   :  { %968 = vmatprep.subr.mxu1 %v549_v33 }
 0x178   :  { %969 = vmatpush3.msra.mxu1 %v533_v53 }
 0x179   :  { %970 = vmatprep.subr.mxu1 %v548_v52 }
 0x17a   :  { %971 = vmatpush3.msra.mxu1 %v532_v55 }
 0x17b   :  { %972 = vmatprep.subr.mxu1 %v547_v23 }
 0x17c   :  { %973 = vmatpush3.msra.mxu1 %v531_v34 }
 0x17d   :  { %974 = vmatprep.subr.mxu1 %v546_v56 }
 0x17e   :  { %975 = vmatpush3.msra.mxu1 %v530_v49 }
 0x17f   :  { %976 = vmatprep.subr.mxu1 %v545_v59 }
 0x180   :  { %977 = vmatpush3.msra.mxu1 %v529_v21 }
 0x181   :  { %978 = vmatprep.subr.mxu1 %v544_v31 }
 0x182   :  { %979 = vmatpush3.msra.mxu1 %v528_v60 }
 0x183   :  { %718 = vmatmul.mubr.f32.vlgmr.msra.gmra.mxu1 %v1494_v41  ;;  %1128 = vmatprep.subr.mxu1 %v1191_v26  ;;  %v735_v41 = vld [vmem:[%s1705_s4 + $0x60] sm:$0xff]  ;;  %s1168_s4 = scalar_lea.vmem %s824_s15, 32 }
 0x184   :  { %1129 = vmatpush3.msra.mxu1 %v738_v4  ;;  %1160 = vmatprep.mubr.msk.f32.mxu1 %vm1192_vm0, %v1191_v26  ;;  %p1169_p0 = scmp.ne.s32.totalorder %s824_s15, %s1168_s4  ;;  %p1174_p2 = scmp.lt.s32.totalorder %s1168_s4, %s1168_s4 }
 0x185   :  { %1130 = vmatprep.subr.mxu1 %v1191_v26 }
 0x186   :  { %1131 = vmatpush3.msra.mxu1 %v737_v57  ;;  %p1175_p3 = por %p1174_p2, %p1173_p1 }
 0x187   :  { %1132 = vmatprep.subr.mxu1 %v1191_v26 }
 0x188   :  { %1133 = vmatpush3.msra.mxu1 %v736_v9  ;;  %p1176_p4 = pnand %p1175_p3, %p1169_p0 }
 0x189   :  { %1134 = vmatprep.subr.mxu1 %v1191_v26 }
 0x18a   :  { %1135 = vmatpush3.msra.mxu1 %v735_v41 }
 0x18b   :  { %1136 = vmatprep.subr.mxu1 %v1191_v26 }
 0x18c   :  { %1137 = vmatpush3.msra.mxu1 %v734_v50 }
 0x18d   :  { %1138 = vmatprep.subr.mxu1 %v1191_v26 }
 0x18e   :  { %1139 = vmatpush3.msra.mxu1 %v733_v32 }
 0x18f   :  { %1140 = vmatprep.subr.mxu1 %v1191_v26 }
 0x190   :  { %1141 = vmatpush3.msra.mxu1 %v732_v62 }
 0x191   :  { %1142 = vmatprep.subr.mxu1 %v1191_v26 }
 0x192   :  { %1143 = vmatpush3.msra.mxu1 %v731_v63 }
 0x193   :  { %1144 = vmatprep.subr.mxu1 %v1191_v26 }
 0x194   :  { %1145 = vmatpush3.msra.mxu1 %v730_v47 }
 0x195   :  { %1146 = vmatprep.subr.mxu1 %v1191_v26 }
 0x196   :  { %1147 = vmatpush3.msra.mxu1 %v729_v29 }
 0x197   :  { %1148 = vmatprep.subr.mxu1 %v1191_v26 }
 0x198   :  { %1149 = vmatpush3.msra.mxu1 %v728_v1 }
 0x199   :  { %1150 = vmatprep.subr.mxu1 %v1191_v26 }
 0x19a   :  { %1151 = vmatpush3.msra.mxu1 %v727_v2 }
 0x19b   :  { %1152 = vmatprep.subr.mxu1 %v1191_v26 }
 0x19c   :  { %1153 = vmatpush3.msra.mxu1 %v726_v48 }
 0x19d   :  { %1154 = vmatprep.subr.mxu1 %v1191_v26 }
 0x19e   :  { %1155 = vmatpush3.msra.mxu1 %v725_v30 }
 0x19f   :  { %1156 = vmatprep.subr.mxu1 %v1191_v26 }
 0x1a0   :  { %1157 = vmatpush3.msra.mxu1 %v724_v5 }
 0x1a1   :  { %1158 = vmatprep.subr.mxu1 %v1191_v26 }
 0x1a2   :  { %1159 = vmatpush3.msra.mxu1 %v723_v6 }
 0x203   :  { %v945_v45 = vpop.f32.mrf.mxu1 }
 0x205   :  { %v946_v27 = vpop.f32.mrf.mxu1 }
 0x206   :  { %v947_v11 = vadd.f32 %v946_v27, %v945_v45 }
 0x243   :  { %v980_v8 = vpop.f32.mrf.mxu1 }
 0x245   :  { %v981_v10 = vpop.f32.mrf.mxu1 }
 0x246   :  { %v982_v46 = vadd.f32 %v981_v10, %v980_v8 }
 0x248   :  { %v720_v12 = vadd.f32 %v982_v46, %v947_v11 }
 0x24a   :  { %1161 = vmatmul.mubr.f32.vlgmr.msra.gmra.mxu1 %v720_v12 }
 0x30a   :  { %v812_v28 = vpop.f32.mrf.mxu1 }
 0x30b   :  { %v813_v13 = vadd.f32 %v832_v3, %v812_v28 }
 0x30c   :  { %v1162_v15 = vpop.f32.mrf.mxu1 }
 0x30d   :  { %816 = vst [vmem:[#allocation2] sm:$0x3] %v813_v13 }
 0x30e   :  { %1179 = shalt.err (!%p1176_p4)
}
 0x30f   :  { %826 = dma.vmem_to_hbm [thread:$0]  %s824_s15, 32, %s1707_s6, [#allocation3]  }
 0x310   :  { %1188 = dma.done.wait [#allocation3], 32  }
 0x311   :  { %1189 = vsyncadd [#allocation3], 4294967264 }
 0x312   :  { %830 = vsyncpa [#allocation3], 1 }

</bundles_post_ra>
